<compile_context>
chip_gen: v7x
topology: tpu7x:2x2x1
jax: 0.10.0
libtpu: 0.0.40
codegen_flags: <defaults>
</compile_context>

<pallas_src>
import functools

import jax
import jax.numpy as jnp
from jax import lax
from jax.experimental import pallas as pl
from jax.experimental.pallas import tpu as pltpu


def _focus_kernel(x_ref, o_ref, *, ht, chunk):
    # x_ref block: (1, Ct, 2*ht, W)      o_ref block: (1, 4, Ct, ht, W // 2)
    ct = x_ref.shape[1]
    w = x_ref.shape[3]
    half = chunk // 2
    n_chunks = w // chunk
    two_ht = 2 * ht

    # --- 0/1 selection matrices (exactly representable in bf16) -------------
    # Row (H-parity) selector: A = P[hp] @ X picks rows hp, hp+2, hp+4, ...
    rr = lax.broadcasted_iota(jnp.int32, (ht, two_ht), 0)
    ii = lax.broadcasted_iota(jnp.int32, (ht, two_ht), 1)
    p_sel = [
        jnp.where(ii == 2 * rr + hp, 1.0, 0.0).astype(jnp.bfloat16)
        for hp in (0, 1)
    ]
    # Lane (W-parity) selector: B = A @ S[wp] picks lanes wp, wp+2, wp+4, ...
    mm = lax.broadcasted_iota(jnp.int32, (chunk, half), 0)
    jj = lax.broadcasted_iota(jnp.int32, (chunk, half), 1)
    s_sel = [
        jnp.where(mm == 2 * jj + wp, 1.0, 0.0).astype(jnp.bfloat16)
        for wp in (0, 1)
    ]

    mask_hi16 = jnp.uint32(0xFFFF0000)

    def channel_body(cc, carry):
        for ci in range(n_chunks):
            # One (2*ht, chunk) slice of the block at a time (low vreg pressure).
            x = x_ref[0, cc, :, pl.ds(ci * chunk, chunk)].astype(jnp.float32)

            # Exact 3-way bf16 limb split via mantissa truncation:
            #   x == l0 + l1 + l2 exactly, each limb bf16-representable.
            u = pltpu.bitcast(x, jnp.uint32)
            l0 = pltpu.bitcast(u & mask_hi16, jnp.float32)
            r = x - l0                                       # exact
            l1 = pltpu.bitcast(pltpu.bitcast(r, jnp.uint32) & mask_hi16,
                               jnp.float32)
            l2 = r - l1                                      # exact
            limbs = (l0.astype(jnp.bfloat16),
                     l1.astype(jnp.bfloat16),
                     l2.astype(jnp.bfloat16))

            for hp in (0, 1):
                # H-parity row selection on the MXU (exact: 0/1 matrix, f32 acc).
                a_limbs = [
                    jnp.dot(p_sel[hp], lb,
                            preferred_element_type=jnp.float32
                            ).astype(jnp.bfloat16)
                    for lb in limbs
                ]  # each (ht, chunk), values unchanged -> bf16-exact cast
                for wp in (0, 1):
                    # W-parity lane selection, then exact limb recombination.
                    acc = jnp.dot(a_limbs[0], s_sel[wp],
                                  preferred_element_type=jnp.float32)
                    acc = acc + jnp.dot(a_limbs[1], s_sel[wp],
                                        preferred_element_type=jnp.float32)
                    acc = acc + jnp.dot(a_limbs[2], s_sel[wp],
                                        preferred_element_type=jnp.float32)
                    plane = 2 * wp + hp  # torch.cat order: (0,0),(1,0),(0,1),(1,1)
                    o_ref[0, plane, cc, :, pl.ds(ci * half, half)] = (
                        acc.astype(o_ref.dtype))
        return carry

    lax.fori_loop(0, ct, channel_body, 0)


def _pick_h_tile(h2, itemsize):
    # Keep the block's second-minor dims aligned to the sublane packing.
    mult = {4: 8, 2: 16, 1: 32}.get(itemsize, 8)
    if h2 % mult != 0:
        return h2
    ht = mult
    for cand in range(mult, min(h2, 32) + 1, mult):
        if h2 % cand == 0:
            ht = cand
    return ht


def _pick_c_tile(c, ht, w, itemsize, target_bytes=2 * 1024 * 1024):
    per_channel = 2 * ht * w * itemsize
    ct = int(max(1, min(c, target_bytes // max(per_channel, 1))))
    while c % ct:
        ct -= 1
    return ct


def _pick_chunk(w):
    # Even divisor of W, at most 16 chunks per row, as close to 128 lanes as possible.
    cands = [c for c in range(2, w + 1, 2) if w % c == 0 and w // c <= 16]
    return min(cands, key=lambda c: abs(c - 128))


def focus(x):
    """x: (B, C, H, W) -> (B, 4C, H//2, W//2), matching the PyTorch module."""
    B, C, H, W = x.shape
    assert H % 2 == 0 and W % 2 == 0, "focus requires even spatial dims"
    H2, W2 = H // 2, W // 2
    itemsize = jnp.dtype(x.dtype).itemsize
    # TODO(synk): integer inputs with |x| >= 2**24 lose exactness through the
    # f32/bf16 limb path; floating-point inputs (the intended use) are exact.

    ht = _pick_h_tile(H2, itemsize)
    ct = _pick_c_tile(C, ht, W, itemsize)
    chunk = _pick_chunk(W)

    grid = (B, C // ct, H2 // ht)

    flops = int(B * C * H2 * W * (24 * ht + 12 * chunk))
    bytes_accessed = int(2 * x.size * itemsize)

    out = pl.pallas_call(
        functools.partial(_focus_kernel, ht=ht, chunk=chunk),
        out_shape=jax.ShapeDtypeStruct((B, 4, C, H2, W2), x.dtype),
        grid=grid,
        in_specs=[
            pl.BlockSpec((1, ct, 2 * ht, W), lambda b, c, h: (b, c, h, 0)),
        ],
        out_specs=pl.BlockSpec((1, 4, ct, ht, W2),
                               lambda b, c, h: (b, 0, c, h, 0)),
        compiler_params=pltpu.CompilerParams(
            dimension_semantics=("parallel", "parallel", "parallel"),
            vmem_limit_bytes=32 * 1024 * 1024,
        ),
        cost_estimate=pl.CostEstimate(
            flops=flops, transcendentals=0, bytes_accessed=bytes_accessed),
    )(x)

    # (B, 4, C, H2, W2) -> (B, 4C, H2, W2): identical channel order to torch.cat.
    return out.reshape(B, 4 * C, H2, W2)


if __name__ == "__main__":
    # The module has no parameters (__init__ is empty); only the input is needed.
    key = jax.random.PRNGKey(0)
    B, C, H, W = 2, 4, 16, 16
    x = jax.random.normal(key, (B, C, H, W), dtype=jnp.float32)

    y = jax.block_until_ready(focus(x))

    # Pure-JAX reference of the PyTorch forward pass.
    ref = jnp.concatenate(
        (x[..., ::2, ::2], x[..., 1::2, ::2],
         x[..., ::2, 1::2], x[..., 1::2, 1::2]),
        axis=1,
    )

    assert y.shape == (B, 4 * C, H // 2, W // 2), y.shape
    assert y.dtype == x.dtype
    assert jnp.array_equal(y, ref), "mismatch vs reference"

    print("KERNEL_OK")
</pallas_src>

<mosaic_0001>
module attributes {stable_mosaic.version = 11 : i64} {
  func.func @_focus_kernel(%arg0: i32, %arg1: i32, %arg2: i32, %arg3: memref<1x4x16x16xf32, #tpu.memory_space<vmem>>, %arg4: memref<1x4x4x8x8xf32, #tpu.memory_space<vmem>>) attributes {dimension_semantics = [#tpu.dimension_semantics<parallel>, #tpu.dimension_semantics<parallel>, #tpu.dimension_semantics<parallel>], iteration_bounds = array<i64: 2, 1, 1>, scalar_prefetch = 0 : i64, scratch_operands = 0 : i64, tpu.core_type = #tpu.core_type<tc>, window_params = [{transform_indices = @transform_0, window_bounds = array<i64: 1, 4, 16, 16>}, {transform_indices = @transform_1, window_bounds = array<i64: 1, 4, 4, 8, 8>}]} {
    %0 = tpu.iota {dimensions = array<i32: 0>} : vector<8x16xi32>
    %1 = tpu.iota {dimensions = array<i32: 1>} : vector<8x16xi32>
    %c2_i32 = arith.constant 2 : i32
    %2 = vector.broadcast %c2_i32 : i32 to vector<8x16xi32>
    %3 = arith.muli %2, %0 : vector<8x16xi32>
    %c0_i32 = arith.constant 0 : i32
    %4 = vector.broadcast %c0_i32 : i32 to vector<8x16xi32>
    %5 = arith.addi %3, %4 : vector<8x16xi32>
    %6 = arith.cmpi eq, %1, %5 : vector<8x16xi32>
    %cst = arith.constant 1.000000e+00 : f32
    %cst_0 = arith.constant 0.000000e+00 : f32
    %7 = vector.broadcast %cst : f32 to vector<8x16xf32>
    %8 = vector.broadcast %cst_0 : f32 to vector<8x16xf32>
    %9 = arith.select %6, %7, %8 : vector<8x16xi1>, vector<8x16xf32>
    %10 = arith.truncf %9 : vector<8x16xf32> to vector<8x16xbf16>
    %c2_i32_1 = arith.constant 2 : i32
    %11 = vector.broadcast %c2_i32_1 : i32 to vector<8x16xi32>
    %12 = arith.muli %11, %0 : vector<8x16xi32>
    %c1_i32 = arith.constant 1 : i32
    %13 = vector.broadcast %c1_i32 : i32 to vector<8x16xi32>
    %14 = arith.addi %12, %13 : vector<8x16xi32>
    %15 = arith.cmpi eq, %1, %14 : vector<8x16xi32>
    %cst_2 = arith.constant 1.000000e+00 : f32
    %cst_3 = arith.constant 0.000000e+00 : f32
    %16 = vector.broadcast %cst_2 : f32 to vector<8x16xf32>
    %17 = vector.broadcast %cst_3 : f32 to vector<8x16xf32>
    %18 = arith.select %15, %16, %17 : vector<8x16xi1>, vector<8x16xf32>
    %19 = arith.truncf %18 : vector<8x16xf32> to vector<8x16xbf16>
    %20 = tpu.iota {dimensions = array<i32: 0>} : vector<16x8xi32>
    %21 = tpu.iota {dimensions = array<i32: 1>} : vector<16x8xi32>
    %c2_i32_4 = arith.constant 2 : i32
    %22 = vector.broadcast %c2_i32_4 : i32 to vector<16x8xi32>
    %23 = arith.muli %22, %21 : vector<16x8xi32>
    %c0_i32_5 = arith.constant 0 : i32
    %24 = vector.broadcast %c0_i32_5 : i32 to vector<16x8xi32>
    %25 = arith.addi %23, %24 : vector<16x8xi32>
    %26 = arith.cmpi eq, %20, %25 : vector<16x8xi32>
    %cst_6 = arith.constant 1.000000e+00 : f32
    %cst_7 = arith.constant 0.000000e+00 : f32
    %27 = vector.broadcast %cst_6 : f32 to vector<16x8xf32>
    %28 = vector.broadcast %cst_7 : f32 to vector<16x8xf32>
    %29 = arith.select %26, %27, %28 : vector<16x8xi1>, vector<16x8xf32>
    %30 = arith.truncf %29 : vector<16x8xf32> to vector<16x8xbf16>
    %c2_i32_8 = arith.constant 2 : i32
    %31 = vector.broadcast %c2_i32_8 : i32 to vector<16x8xi32>
    %32 = arith.muli %31, %21 : vector<16x8xi32>
    %c1_i32_9 = arith.constant 1 : i32
    %33 = vector.broadcast %c1_i32_9 : i32 to vector<16x8xi32>
    %34 = arith.addi %32, %33 : vector<16x8xi32>
    %35 = arith.cmpi eq, %20, %34 : vector<16x8xi32>
    %cst_10 = arith.constant 1.000000e+00 : f32
    %cst_11 = arith.constant 0.000000e+00 : f32
    %36 = vector.broadcast %cst_10 : f32 to vector<16x8xf32>
    %37 = vector.broadcast %cst_11 : f32 to vector<16x8xf32>
    %38 = arith.select %35, %36, %37 : vector<16x8xi1>, vector<16x8xf32>
    %39 = arith.truncf %38 : vector<16x8xf32> to vector<16x8xbf16>
    %c-65536_i32 = arith.constant -65536 : i32
    %c0_i32_12 = arith.constant 0 : i32
    %c4_i32 = arith.constant 4 : i32
    %40 = arith.addi %c0_i32_12, %c4_i32 : i32
    %c1_i32_13 = arith.constant 1 : i32
    scf.for %arg5 = %c0_i32_12 to %40 step %c1_i32_13  : i32 {
      %c0 = arith.constant 0 : index
      %41 = arith.index_cast %arg5 : i32 to index
      %c0_15 = arith.constant 0 : index
      %c0_16 = arith.constant 0 : index
      %42 = vector.load %arg3[%c0, %41, %c0_15, %c0_16] : memref<1x4x16x16xf32, #tpu.memory_space<vmem>>, vector<1x1x16x16xf32>
      %43 = vector.shape_cast %42 : vector<1x1x16x16xf32> to vector<16x16xf32>
      %44 = tpu.bitcast %43 : vector<16x16xf32> -> vector<16x16xi32>
      %45 = vector.broadcast %c-65536_i32 : i32 to vector<16x16xi32>
      %46 = arith.andi %44, %45 : vector<16x16xi32>
      %47 = tpu.bitcast %46 : vector<16x16xi32> -> vector<16x16xf32>
      %48 = arith.subf %43, %47 : vector<16x16xf32>
      %49 = tpu.bitcast %48 : vector<16x16xf32> -> vector<16x16xi32>
      %50 = vector.broadcast %c-65536_i32 : i32 to vector<16x16xi32>
      %51 = arith.andi %49, %50 : vector<16x16xi32>
      %52 = tpu.bitcast %51 : vector<16x16xi32> -> vector<16x16xf32>
      %53 = arith.subf %48, %52 : vector<16x16xf32>
      %54 = arith.truncf %47 : vector<16x16xf32> to vector<16x16xbf16>
      %55 = arith.truncf %52 : vector<16x16xf32> to vector<16x16xbf16>
      %56 = arith.truncf %53 : vector<16x16xf32> to vector<16x16xbf16>
      %cst_17 = arith.constant dense<0.000000e+00> : vector<8x16xf32>
      %57 = tpu.matmul %10, %54, %cst_17 {dimension_numbers = #tpu.dot_dimension_numbers<[1], [0], [0], [1], [0, 0, 1, 1], [], []>} : vector<8x16xbf16>, vector<16x16xbf16>, vector<8x16xf32> -> vector<8x16xf32>
      %58 = arith.truncf %57 : vector<8x16xf32> to vector<8x16xbf16>
      %cst_18 = arith.constant dense<0.000000e+00> : vector<8x16xf32>
      %59 = tpu.matmul %10, %55, %cst_18 {dimension_numbers = #tpu.dot_dimension_numbers<[1], [0], [0], [1], [0, 0, 1, 1], [], []>} : vector<8x16xbf16>, vector<16x16xbf16>, vector<8x16xf32> -> vector<8x16xf32>
      %60 = arith.truncf %59 : vector<8x16xf32> to vector<8x16xbf16>
      %cst_19 = arith.constant dense<0.000000e+00> : vector<8x16xf32>
      %61 = tpu.matmul %10, %56, %cst_19 {dimension_numbers = #tpu.dot_dimension_numbers<[1], [0], [0], [1], [0, 0, 1, 1], [], []>} : vector<8x16xbf16>, vector<16x16xbf16>, vector<8x16xf32> -> vector<8x16xf32>
      %62 = arith.truncf %61 : vector<8x16xf32> to vector<8x16xbf16>
      %cst_20 = arith.constant dense<0.000000e+00> : vector<8x8xf32>
      %63 = tpu.matmul %58, %30, %cst_20 {dimension_numbers = #tpu.dot_dimension_numbers<[1], [0], [0], [1], [0, 0, 1, 1], [], []>} : vector<8x16xbf16>, vector<16x8xbf16>, vector<8x8xf32> -> vector<8x8xf32>
      %cst_21 = arith.constant dense<0.000000e+00> : vector<8x8xf32>
      %64 = tpu.matmul %60, %30, %cst_21 {dimension_numbers = #tpu.dot_dimension_numbers<[1], [0], [0], [1], [0, 0, 1, 1], [], []>} : vector<8x16xbf16>, vector<16x8xbf16>, vector<8x8xf32> -> vector<8x8xf32>
      %65 = arith.addf %63, %64 : vector<8x8xf32>
      %cst_22 = arith.constant dense<0.000000e+00> : vector<8x8xf32>
      %66 = tpu.matmul %62, %30, %cst_22 {dimension_numbers = #tpu.dot_dimension_numbers<[1], [0], [0], [1], [0, 0, 1, 1], [], []>} : vector<8x16xbf16>, vector<16x8xbf16>, vector<8x8xf32> -> vector<8x8xf32>
      %67 = arith.addf %65, %66 : vector<8x8xf32>
      %c0_23 = arith.constant 0 : index
      %c0_24 = arith.constant 0 : index
      %68 = arith.index_cast %arg5 : i32 to index
      %c0_25 = arith.constant 0 : index
      %c0_26 = arith.constant 0 : index
      %69 = vector.load %arg4[%c0_23, %c0_24, %68, %c0_25, %c0_26] : memref<1x4x4x8x8xf32, #tpu.memory_space<vmem>>, vector<1x1x1x8x8xf32>
      %70 = vector.shape_cast %69 : vector<1x1x1x8x8xf32> to vector<8x8xf32>
      %71 = vector.shape_cast %67 : vector<8x8xf32> to vector<1x1x1x8x8xf32>
      tpu.vector_store %arg4[%c0_23, %c0_24, %68, %c0_25, %c0_26], %71 {strides = array<i32>} : memref<1x4x4x8x8xf32, #tpu.memory_space<vmem>>, vector<1x1x1x8x8xf32>,
      %cst_27 = arith.constant dense<0.000000e+00> : vector<8x8xf32>
      %72 = tpu.matmul %58, %39, %cst_27 {dimension_numbers = #tpu.dot_dimension_numbers<[1], [0], [0], [1], [0, 0, 1, 1], [], []>} : vector<8x16xbf16>, vector<16x8xbf16>, vector<8x8xf32> -> vector<8x8xf32>
      %cst_28 = arith.constant dense<0.000000e+00> : vector<8x8xf32>
      %73 = tpu.matmul %60, %39, %cst_28 {dimension_numbers = #tpu.dot_dimension_numbers<[1], [0], [0], [1], [0, 0, 1, 1], [], []>} : vector<8x16xbf16>, vector<16x8xbf16>, vector<8x8xf32> -> vector<8x8xf32>
      %74 = arith.addf %72, %73 : vector<8x8xf32>
      %cst_29 = arith.constant dense<0.000000e+00> : vector<8x8xf32>
      %75 = tpu.matmul %62, %39, %cst_29 {dimension_numbers = #tpu.dot_dimension_numbers<[1], [0], [0], [1], [0, 0, 1, 1], [], []>} : vector<8x16xbf16>, vector<16x8xbf16>, vector<8x8xf32> -> vector<8x8xf32>
      %76 = arith.addf %74, %75 : vector<8x8xf32>
      %c0_30 = arith.constant 0 : index
      %c2 = arith.constant 2 : index
      %77 = arith.index_cast %arg5 : i32 to index
      %c0_31 = arith.constant 0 : index
      %c0_32 = arith.constant 0 : index
      %78 = vector.load %arg4[%c0_30, %c2, %77, %c0_31, %c0_32] : memref<1x4x4x8x8xf32, #tpu.memory_space<vmem>>, vector<1x1x1x8x8xf32>
      %79 = vector.shape_cast %78 : vector<1x1x1x8x8xf32> to vector<8x8xf32>
      %80 = vector.shape_cast %76 : vector<8x8xf32> to vector<1x1x1x8x8xf32>
      tpu.vector_store %arg4[%c0_30, %c2, %77, %c0_31, %c0_32], %80 {strides = array<i32>} : memref<1x4x4x8x8xf32, #tpu.memory_space<vmem>>, vector<1x1x1x8x8xf32>,
      %cst_33 = arith.constant dense<0.000000e+00> : vector<8x16xf32>
      %81 = tpu.matmul %19, %54, %cst_33 {dimension_numbers = #tpu.dot_dimension_numbers<[1], [0], [0], [1], [0, 0, 1, 1], [], []>} : vector<8x16xbf16>, vector<16x16xbf16>, vector<8x16xf32> -> vector<8x16xf32>
      %82 = arith.truncf %81 : vector<8x16xf32> to vector<8x16xbf16>
      %cst_34 = arith.constant dense<0.000000e+00> : vector<8x16xf32>
      %83 = tpu.matmul %19, %55, %cst_34 {dimension_numbers = #tpu.dot_dimension_numbers<[1], [0], [0], [1], [0, 0, 1, 1], [], []>} : vector<8x16xbf16>, vector<16x16xbf16>, vector<8x16xf32> -> vector<8x16xf32>
      %84 = arith.truncf %83 : vector<8x16xf32> to vector<8x16xbf16>
      %cst_35 = arith.constant dense<0.000000e+00> : vector<8x16xf32>
      %85 = tpu.matmul %19, %56, %cst_35 {dimension_numbers = #tpu.dot_dimension_numbers<[1], [0], [0], [1], [0, 0, 1, 1], [], []>} : vector<8x16xbf16>, vector<16x16xbf16>, vector<8x16xf32> -> vector<8x16xf32>
      %86 = arith.truncf %85 : vector<8x16xf32> to vector<8x16xbf16>
      %cst_36 = arith.constant dense<0.000000e+00> : vector<8x8xf32>
      %87 = tpu.matmul %82, %30, %cst_36 {dimension_numbers = #tpu.dot_dimension_numbers<[1], [0], [0], [1], [0, 0, 1, 1], [], []>} : vector<8x16xbf16>, vector<16x8xbf16>, vector<8x8xf32> -> vector<8x8xf32>
      %cst_37 = arith.constant dense<0.000000e+00> : vector<8x8xf32>
      %88 = tpu.matmul %84, %30, %cst_37 {dimension_numbers = #tpu.dot_dimension_numbers<[1], [0], [0], [1], [0, 0, 1, 1], [], []>} : vector<8x16xbf16>, vector<16x8xbf16>, vector<8x8xf32> -> vector<8x8xf32>
      %89 = arith.addf %87, %88 : vector<8x8xf32>
      %cst_38 = arith.constant dense<0.000000e+00> : vector<8x8xf32>
      %90 = tpu.matmul %86, %30, %cst_38 {dimension_numbers = #tpu.dot_dimension_numbers<[1], [0], [0], [1], [0, 0, 1, 1], [], []>} : vector<8x16xbf16>, vector<16x8xbf16>, vector<8x8xf32> -> vector<8x8xf32>
      %91 = arith.addf %89, %90 : vector<8x8xf32>
      %c0_39 = arith.constant 0 : index
      %c1 = arith.constant 1 : index
      %92 = arith.index_cast %arg5 : i32 to index
      %c0_40 = arith.constant 0 : index
      %c0_41 = arith.constant 0 : index
      %93 = vector.load %arg4[%c0_39, %c1, %92, %c0_40, %c0_41] : memref<1x4x4x8x8xf32, #tpu.memory_space<vmem>>, vector<1x1x1x8x8xf32>
      %94 = vector.shape_cast %93 : vector<1x1x1x8x8xf32> to vector<8x8xf32>
      %95 = vector.shape_cast %91 : vector<8x8xf32> to vector<1x1x1x8x8xf32>
      tpu.vector_store %arg4[%c0_39, %c1, %92, %c0_40, %c0_41], %95 {strides = array<i32>} : memref<1x4x4x8x8xf32, #tpu.memory_space<vmem>>, vector<1x1x1x8x8xf32>,
      %cst_42 = arith.constant dense<0.000000e+00> : vector<8x8xf32>
      %96 = tpu.matmul %82, %39, %cst_42 {dimension_numbers = #tpu.dot_dimension_numbers<[1], [0], [0], [1], [0, 0, 1, 1], [], []>} : vector<8x16xbf16>, vector<16x8xbf16>, vector<8x8xf32> -> vector<8x8xf32>
      %cst_43 = arith.constant dense<0.000000e+00> : vector<8x8xf32>
      %97 = tpu.matmul %84, %39, %cst_43 {dimension_numbers = #tpu.dot_dimension_numbers<[1], [0], [0], [1], [0, 0, 1, 1], [], []>} : vector<8x16xbf16>, vector<16x8xbf16>, vector<8x8xf32> -> vector<8x8xf32>
      %98 = arith.addf %96, %97 : vector<8x8xf32>
      %cst_44 = arith.constant dense<0.000000e+00> : vector<8x8xf32>
      %99 = tpu.matmul %86, %39, %cst_44 {dimension_numbers = #tpu.dot_dimension_numbers<[1], [0], [0], [1], [0, 0, 1, 1], [], []>} : vector<8x16xbf16>, vector<16x8xbf16>, vector<8x8xf32> -> vector<8x8xf32>
      %100 = arith.addf %98, %99 : vector<8x8xf32>
      %c0_45 = arith.constant 0 : index
      %c3 = arith.constant 3 : index
      %101 = arith.index_cast %arg5 : i32 to index
      %c0_46 = arith.constant 0 : index
      %c0_47 = arith.constant 0 : index
      %102 = vector.load %arg4[%c0_45, %c3, %101, %c0_46, %c0_47] : memref<1x4x4x8x8xf32, #tpu.memory_space<vmem>>, vector<1x1x1x8x8xf32>
      %103 = vector.shape_cast %102 : vector<1x1x1x8x8xf32> to vector<8x8xf32>
      %104 = vector.shape_cast %100 : vector<8x8xf32> to vector<1x1x1x8x8xf32>
      tpu.vector_store %arg4[%c0_45, %c3, %101, %c0_46, %c0_47], %104 {strides = array<i32>} : memref<1x4x4x8x8xf32, #tpu.memory_space<vmem>>, vector<1x1x1x8x8xf32>,
    }
    %c4_i32_14 = arith.constant 4 : i32
    return
  }
  func.func @transform_0(%arg0: i32, %arg1: i32, %arg2: i32) -> (i32, i32, i32, i32) {
    %c0_i32 = arith.constant 0 : i32
    %c0_i32_0 = arith.constant 0 : i32
    return %arg0, %arg1, %arg2, %c0_i32 : i32, i32, i32, i32
  }
  func.func @transform_1(%arg0: i32, %arg1: i32, %arg2: i32) -> (i32, i32, i32, i32, i32) {
    %c0_i32 = arith.constant 0 : i32
    %c0_i32_0 = arith.constant 0 : i32
    %c0_i32_1 = arith.constant 0 : i32
    return %arg0, %c0_i32, %arg1, %arg2, %c0_i32_0 : i32, i32, i32, i32, i32
  }
}

</mosaic_0001>

<bundles_post_ra>
// kernel: tpu_custom_call.1
= control target key start
LH: loop header
LB: loop body
LE: loop exit
PB: predicated region body
PF: predicated region fallthrough
CT: control target
= control target key end

     0   :  { %6 = vsyncpa [#allocation3], 0  ;;  %s1944_s0 = inlined_call_operand.hbm [shape: f32[2,4,16,16], index: 0, kind: input, shape index: {}]   ;;  %s1945_s1 = inlined_call_operand.hbm [shape: f32[2,4,4,8,8], index: 1, kind: output, shape index: {}]  }
   0x1   :  { %8 = vsyncpa [#allocation3 + $0x1], 0 }
   0x2   :  { %9 = vsyncpa [#allocation4], 0 }
   0x3   :  { %11 = vsyncpa [#allocation4 + $0x1], 0  ;;  %s1584_s6 = smov 0   ;;  %s1586_s7 = smov 0  }
   0x4   :  { %s1588_s8 = smov 0   ;;  %s1590_s9 = smov 0  }
   0x5   :  { %s1592_s10 = smov 0   ;;  %s1594_s11 = smov 0  }
   0x6 LB: > { %s1121_s12 = sadd.s32 4294967295, %s1558_s11   ;;  %s1122_s13 = sadd.s32 4294967294, %s1558_s11   ;;  %s1558_s11 = sphi %s1594_s11, %s17_s11   ;;  %s1554_s10 = sphi %s1592_s10, %s1964_s10   ;;  %s1550_s9 = sphi %s1590_s9, %s1963_s9   ;;  %s1546_s8 = sphi %s1588_s8, %s1962_s8   ;;  %s1542_s7 = sphi %s1586_s7, %s1961_s7   ;;  %s1538_s6 = sphi %s1584_s6, %s1960_s6  }
   0x7   : > { %s36_s14 = sadd.s32 1, %s1554_s10  ;;  %s47_s15 = sadd.s32 1, %s1546_s8 }
   0x8   : > { %p38_p0 = scmp.ge.s32.totalorder %s36_s14, 2  ;;  %p54_p1 = scmp.ne.s32.totalorder %s1546_s8, %s1542_s7 }
   0x9   : > { %p55_p2 = scmp.eq.s32.totalorder %s1558_s11, 0  ;;  %p60_p3 = scmp.ne.s32.totalorder %s1542_s7, %s1538_s6 }
   0xa   : > { %s1966_s14 = smov (%p38_p0, %s36_s14), 0  ;;  %p61_p5 = scmp.eq.s32.totalorder %s1121_s12, 0 }
   0xb   : > { %p1625_p4 = por %p55_p2, %p54_p1  ;;  %s40_s17 = ssub.s32 %s1554_s10, %s1966_s14 }
   0xc   : > { %p88_p6 = scmp.eq.s32.totalorder %s1121_s12, 1  ;;  %p45_p7 = scmp.eq.s32.totalorder %s40_s17, 0 }
   0xd   : > { %p1631_p8 = por %p61_p5, %p60_p3  ;;  %p94_p10 = scmp.eq.s32.totalorder %s1122_s13, 1 }
   0xe   : > { %p1635_p9 = por %p88_p6, %p54_p1  ;;  %p1376_p13 = scmp.lt.s32.totalorder %s1558_s11, 2 }
   0xf   : > { %s1640_s20 = scalar_select %p45_p7, %s1546_s8, %s47_s15  }
  0x10   : > { %s1949_s19 = scalar_select %p1635_p9, 1, 0 }
  0x11   : > { %p1642_p11 = por %p94_p10, %p60_p3  ;;  %s114_s22 = sand.u32 1, %s1546_s8  }
  0x12   : > { %s1125_s23 = sshll.u32 %s114_s22, 6  ;;  %s1186_s24 = sshll.u32 %s1554_s10, 10 }
  0x13   : > { %s1950_s21 = scalar_select %p1642_p11, 1, 0 }
  0x14   : > { %s1653_s27 = scalar_lea.hbm %s1944_s0, %s1186_s24  ;;  %s118_s28 = scalar_lea.vmem [#allocation2], %s1125_s23 }
  0x15   : > { %s130_s29 = sshll.u32 %s118_s28, 4  ;;  %p1659_p0 = pnand %p1376_p13, %p1625_p4  ;;  %s1655_s29 = int_to_ptr.vmem [resolvable:$true] %s130_s29 }
  0x16   : > { %s1664_s2 = scalar_lea.sflag [#allocation3], %s114_s22  ;;  %s1442_s3 = scalar_lea.hbm %s1653_s27, 1024 }
  0x17   : > { %p1443_p2 = scmp.ne.s32.totalorder %s1653_s27, %s1442_s3  ;;  %p1444_p3 = pneg %p1659_p0 }
  0x18   : > { %s1447_s12 = scalar_lea.hbm %s1944_s0, 2048  ;;  %p1448_p4 = scmp.lt.u32.totalorder %s1653_s27, %s1944_s0 }
  0x19   : > { %p1445_p5 = pnand %p1444_p3, %p1443_p2  ;;  %p1449_p7 = scmp.lt.u32.totalorder %s1447_s12, %s1442_s3 }
  0x1a   : > { %p1451_p13 = scmp.lt.u32.totalorder %s1442_s3, %s1653_s27 }
  0x1b   : > { %p1446_p6 = pneg %p1445_p5  ;;  %p1450_p10 = por %p1449_p7, %p1448_p4 }
  0x1d   : > { %p1452_p12 = por %p1451_p13, %p1450_p10 }
  0x1f   : > { %p1453_p1 = pnand %p1452_p12, %p1446_p6 }
  0x21   : > { %1456 = shalt.err (!%p1453_p1)
}
  0x22   : > { %s1457_s16 = scalar_lea.vmem %s1655_s29, 1024  ;;  %s1564_s17 = smov [#allocation2]  }
  0x23   : > { %p1458_p2 = scmp.ne.s32.totalorder %s1655_s29, %s1457_s16  ;;  %s1462_s22 = sshll.u32 %s1564_s17, 4  ;;  %s1463_s22 = int_to_ptr.vmem [resolvable:$false] %s1462_s22 }
  0x24   : > { %s1464_s23 = scalar_lea.vmem %s1463_s22, 2048  ;;  %p1465_p9 = scmp.lt.s32.totalorder %s1655_s29, %s1463_s22 }
  0x25   : > { %p1460_p5 = pnand %p1458_p2, %p1444_p3  ;;  %p1466_p4 = scmp.lt.s32.totalorder %s1464_s23, %s1457_s16 }
  0x27   : > { %p1461_p11 = pneg %p1460_p5  ;;  %p1467_p7 = por %p1466_p4, %p1465_p9 }
  0x29   : > { %p1468_p10 = pnand %p1467_p7, %p1461_p11 }
  0x2b   : > { %1471 = shalt.err (!%p1468_p10)
}
  0x2c   : > { %s1565_s24 = smov 128   ;;  %s1566_s25 = smov 8  }
  0x2d   : > { %1371 = dma.hbm_to_vmem [thread:$0]  (!%p1659_p0), %s1653_s27, 1024, %s1655_s29, %s1664_s2, %s1565_s24, %s1565_s24, %s1566_s25  }
  0x2e   : > { %p138_p12 = scmp.lt.s32.totalorder %s1558_s11, 3  ;;  %p1952_p1 = scmp.ge.s32.totalorder %s1558_s11, 1 }
  0x30   : > { %p139_p3 = pnand %p1952_p1, %p138_p12 }
  0x31   : > { %s1696_s26 = sand.u32 (!%p139_p3), 1, %s1542_s7  }
  0x32   : > { %142 = sbr.rel (%p139_p3) target bundleno = 796 (0x31c), region = 24  ;;  %s1129_s28 = sshll.u32 (!%p139_p3), %s1696_s26, 6 }
  0x33   : > { %s145_s3 = scalar_lea.sflag (!%p139_p3), [#allocation3], %s1696_s26  ;;  %s1700_s4 = scalar_lea.vmem (!%p139_p3), [#allocation2], %s1129_s28 }
  0x39   : > { %1529 = dma.done.wait (%p1631_p8), %s145_s3, 1024  }
  0x3a   : > { %1531 = vsyncadd (%p1631_p8), %s145_s3, 4294966272  ;;  %s1130_s27 = sshll.u32 %s1696_s26, 7  ;;  %v171_v0 = vlaneseq  ;;  %v1567_v7 = vmov 0.0   ;;  %s1732_s29 = smov 0  }
  0x3b   : > { %s1730_s18 = scalar_lea.vmem [#allocation5], %s1130_s27 }
  0x3c   : > { %v1707_v1 = vshrl.u32 %v171_v0, 7  ;;  %v174_v2 = vand.u32 127, %v171_v0 }
  0x3e   : > { %v175_v3 = vmul.u32 2, %v1707_v1  ;;  %v1711_v4 = vadd.s32 8, %v1707_v1  ;;  %v1713_v5 = vmul.u32 2, %v174_v2 }
  0x40   : > { %vm176_vm0 = vcmp.eq.s32.totalorder %v174_v2, %v175_v3  ;;  %v179_v6 = vadd.s32 1, %v175_v3  ;;  %vm185_vm1 = vcmp.eq.s32.totalorder %v1707_v1, %v1713_v5  ;;  %vm186_vm2 = vcmp.eq.s32.totalorder %v1711_v4, %v1713_v5 }
  0x41   : > { %v177_v8 = vsel %vm176_vm0, 1.0, %v1567_v7  ;;  %v1720_v9 = vadd.s32 1, %v1713_v5 }
  0x42   : > { %v1722_v10 = vpack.c.bf16 %v177_v8, %v177_v8  ;;  %vm180_vm3 = vcmp.eq.s32.totalorder %v174_v2, %v179_v6 }
  0x43   : > { %v181_v11 = vsel %vm180_vm3, 1.0, %v1567_v7  ;;  %vm191_vm4 = vcmp.eq.s32.totalorder %v1707_v1, %v1720_v9  ;;  %vm192_vm5 = vcmp.eq.s32.totalorder %v1711_v4, %v1720_v9 }
  0x44   : > { %v1728_v12 = vpack.c.bf16 %v181_v11, %v181_v11 }
  0x45 LB: >> { %v1568_v13 = vmov 0.0   ;;  %vm1569_vm6 = vmmov 0   ;;  %s1131_s30 = sshll.u32 %s1562_s29, 4  ;;  %vm225_vm7 = vcmask 130048   ;;  %vm1762_vm8 = vmpackc.low %vm192_vm5, %vm191_vm4  ;;  %v1570_v28 = vmov 1.0|1.0   ;;  %s1562_s29 = sphi %s1732_s29, %s201_s29  }
  0x46   : >> { %1230 = vmatprep.subr.bf16.mxu1 %v1568_v13  ;;  %1232 = vmatprep.mubr.msk.bf16.mxu1 %vm1569_vm6, %v1568_v13  ;;  %s203_s2 = scalar_lea.vmem %s1700_s4, %s1131_s30 [#allocation2]  ;;  %vm1780_vm9 = vmpackc.low %vm186_vm2, %vm185_vm1  ;;  %s1144_s5 = sshll.u32 %s1562_s29, 3  ;;  %vm484_vm10 = vcmask 64512  }
  0x47   : >> { %1224 = vmatprep.subr.bf16.mxu0 %v1568_v13  ;;  %1226 = vmatprep.mubr.msk.bf16.mxu0 %vm1569_vm6, %v1568_v13  ;;  %v204_v14 = vld [vmem:[%s203_s2] sm:$0xff]  ;;  %v205_v15 = vld [vmem:[%s203_s2 + $0x8] sm:$0xff]  ;;  %s1847_s12 = scalar_lea.vmem %s1730_s18, %s1144_s5 [#allocation5]  ;;  %s201_s29 = sadd.s32 1, %s1562_s29  }
  0x48   : >> { %v208_v16 = vand.u32 4294901760, %v204_v14  ;;  %v209_v17 = vand.u32 4294901760, %v205_v15  ;;  %p198_p8 = scmp.ge.s32.totalorder %s201_s29, 4  }
  0x49   : > { %s1187_s13 = sshll.u32 (%p198_p8), %s1550_s9, 11  ;;  %s1010_s22 = sshll.u32 (%p198_p8), %s1730_s18, 4  ;;  %s1895_s22 = int_to_ptr.vmem [resolvable:$true] %s1010_s22 }
  0x4a   : >> { %v212_v18 = vsub.f32 %v204_v14, %v208_v16  ;;  %v213_v19 = vsub.f32 %v205_v15, %v209_v17  ;;  %v222_v20 = vpack.c.bf16 %v209_v17, %v208_v16  ;;  %s1892_s17 = scalar_lea.hbm (%p198_p8), %s1945_s1, %s1187_s13  ;;  %s994_s23 = scalar_lea.sflag (%p198_p8), [#allocation4], %s1696_s26 }
  0x4b   : > { %s1472_s24 = scalar_lea.vmem (%p198_p8), %s1895_s22, 2048  ;;  %p1957_p11 = scmp.ne.s32.totalorder (%p198_p8), %s1949_s19, 0 }
  0x4c   : >> { %v216_v21 = vand.u32 4294901760, %v212_v18  ;;  %v217_v22 = vand.u32 4294901760, %v213_v19  ;;  %1225 = vmatpush3.bf16.msra.mxu0 %v222_v20  ;;  %p1473_p9 = scmp.ne.s32.totalorder (%p198_p8), %s1895_s22, %s1472_s24  ;;  %s1571_s25 = smov (%p198_p8), [#allocation5]  }
  0x4d   : >> { %1236 = vmatprep.subr.bf16.mxu0 %v1568_v13  ;;  %s1476_s28 = sshll.u32 (%p198_p8), %s1571_s25, 4  ;;  %s1477_s28 = int_to_ptr.vmem [resolvable:$false] %s1476_s28 }
  0x4e   : >> { %v220_v23 = vsub.f32 %v212_v18, %v216_v21  ;;  %v221_v24 = vsub.f32 %v213_v19, %v217_v22  ;;  %v223_v25 = vpack.c.bf16 %v217_v22, %v216_v21  ;;  %p1474_p0 = pnand (%p198_p8), %p1473_p9, %p1957_p11  ;;  %s1478_s9 = scalar_lea.vmem (%p198_p8), %s1477_s28, 4096 }
  0x4f   : >> { %1227 = vmatmul.mubr.msk.bf16.vlgmr.msra.gmra.mrb[0].mxu0 %vm225_vm7, %v1722_v10  ;;  %p1479_p13 = scmp.lt.s32.totalorder (%p198_p8), %s1895_s22, %s1477_s28  ;;  %p1480_p2 = scmp.lt.s32.totalorder (%p198_p8), %s1478_s9, %s1472_s24 }
  0x50   : >> { %1231 = vmatpush3.bf16.msra.mxu1 %v223_v25  ;;  %v224_v26 = vpack.c.bf16 %v221_v24, %v220_v23  ;;  %1238 = vmatprep.mubr.msk.bf16.mxu0 %vm1569_vm6, %v1568_v13  ;;  %p1475_p6 = pneg (%p198_p8), %p1474_p0 }
  0x51   : >> { %1242 = vmatprep.subr.bf16.mxu1 %v1568_v13  ;;  %p1481_p5 = por (%p198_p8), %p1480_p2, %p1479_p13 }
  0x52   : >> { %1237 = vmatpush3.bf16.msra.mxu0 %v224_v26 }
  0x53   : >> { %1233 = vmatmul.mubr.msk.bf16.vlgmr.msra.gmra.mrb[0].mxu1 %vm225_vm7, %v1722_v10  ;;  %1260 = vmatprep.subr.bf16.mxu0 %v1568_v13  ;;  %p1482_p4 = pnand (%p198_p8), %p1481_p5, %p1475_p6 }
  0x54   : >> { %1244 = vmatprep.mubr.msk.bf16.mxu1 %vm1569_vm6, %v1568_v13  ;;  %1243 = vmatpush3.bf16.msk.msra.mxu1 %vm1780_vm9, %v1570_v28 }
  0x55   : >> { %1248 = vmatprep.subr.bf16.mxu1 %v1568_v13 }
  0x57   : >> { %1239 = vmatmul.mubr.msk.bf16.vlgmr.msra.gmra.mrb[4].mxu0 %vm225_vm7, %v1722_v10 }
  0x58   : >> { %1261 = vmatpush3.bf16.msk.msra.mxu0 %vm1762_vm8, %v1570_v28  ;;  %1262 = vmatprep.mubr.msk.bf16.mxu0 %vm1569_vm6, %v1568_v13 }
  0x59   : >> { %1266 = vmatprep.subr.bf16.mxu0 %v1568_v13 }
 0x122   : >> { %v263_v30 = vpop.f32.mrb[0].mxu0 }
 0x123   : >> { %v1228_v31 = vpop.f32.mrb[1].mxu0  ;;  %v269_v43 = vpack.c.bf16 %v263_v30, %v263_v30 }
 0x124   : >> { %v266_v32 = vpop.f32.mrb[2].mxu0 }
 0x125   : >> { %v1229_v33 = vpop.f32.mrb[3].mxu0 }
 0x126   : >> { %v304_v34 = vpop.f32.mrb[0].mxu1 }
 0x127   : >> { %v310_v35 = vpack.c.bf16 %v304_v34, %v304_v34  ;;  %v1234_v36 = vpop.f32.mrb[1].mxu1 }
 0x128   : >> { %v307_v37 = vpop.f32.mrb[2].mxu1 }
 0x129   : >> { %v1235_v38 = vpop.f32.mrb[3].mxu1  ;;  %1245 = vmatmul.mubr.msk.bf16.vlgmr.msra.gmra.mrb[4].mxu1 %vm225_vm7, %v310_v35  ;;  %1263 = vmatmul.mubr.msk.bf16.vlgmr.msra.gmra.mrb[8].mxu0 %vm225_vm7, %v310_v35 }
 0x12a   : >> { %1267 = vmatpush3.bf16.msk.msra.mxu0 %vm1762_vm8, %v1570_v28  ;;  %1249 = vmatpush3.bf16.msk.msra.mxu1 %vm1780_vm9, %v1570_v28  ;;  %v345_v39 = vpop.f32.mrb[4].mxu0 }
 0x12b   : >> { %1250 = vmatprep.mubr.msk.bf16.mxu1 %vm1569_vm6, %v1568_v13  ;;  %1268 = vmatprep.mubr.msk.bf16.mxu0 %vm1569_vm6, %v1568_v13  ;;  %v1240_v40 = vpop.f32.mrb[5].mxu0  ;;  %v351_v44 = vpack.c.bf16 %v345_v39, %v345_v39 }
 0x12c   : >> { %1272 = vmatprep.subr.bf16.mxu0 %v1568_v13  ;;  %v348_v41 = vpop.f32.mrb[6].mxu0  ;;  %1254 = vmatprep.subr.bf16.mxu1 %v1568_v13 }
 0x12d   : >> { %v1241_v42 = vpop.f32.mrb[7].mxu0 }
 0x135   : >> { %1251 = vmatmul.mubr.msk.bf16.vlgmr.msra.gmra.mrb[4].mxu1 %vm225_vm7, %v269_v43  ;;  %1269 = vmatmul.mubr.msk.bf16.vlgmr.msra.gmra.mrb[8].mxu0 %vm225_vm7, %v269_v43 }
 0x136   : >> { %1273 = vmatpush3.bf16.msk.msra.mxu0 %vm1762_vm8, %v1570_v28  ;;  %1255 = vmatpush3.bf16.msk.msra.mxu1 %vm1780_vm9, %v1570_v28 }
 0x137   : >> { %1256 = vmatprep.mubr.msk.bf16.mxu1 %vm1569_vm6, %v1568_v13  ;;  %1274 = vmatprep.mubr.msk.bf16.mxu0 %vm1569_vm6, %v1568_v13 }
 0x138   : >> { %1284 = vmatprep.subr.bf16.mxu0 %v1568_v13  ;;  %1278 = vmatprep.subr.bf16.mxu1 %v1568_v13 }
 0x141   : >> { %1257 = vmatmul.mubr.msk.bf16.vlgmr.msra.gmra.mrb[4].mxu1 %vm225_vm7, %v351_v44  ;;  %1275 = vmatmul.mubr.msk.bf16.vlgmr.msra.gmra.mrb[8].mxu0 %vm225_vm7, %v351_v44 }
 0x142   : >> { %1285 = vmatpush3.bf16.msra.mxu0 %v223_v25  ;;  %1286 = vmatprep.mubr.msk.bf16.mxu0 %vm1569_vm6, %v1568_v13 }
 0x143   : >> { %1279 = vmatpush3.bf16.msra.mxu1 %v222_v20  ;;  %1280 = vmatprep.mubr.msk.bf16.mxu1 %vm1569_vm6, %v1568_v13 }
 0x144   : >> { %1290 = vmatprep.subr.bf16.mxu1 %v1568_v13  ;;  %1296 = vmatprep.subr.bf16.mxu0 %v1568_v13 }
 0x149   : >> { %1287 = vmatmul.mubr.msk.bf16.vlgmr.msra.gmra.mrb[12].mxu0 %vm225_vm7, %v1728_v12  ;;  %1281 = vmatmul.mubr.msk.bf16.vlgmr.msra.gmra.mrb[8].mxu1 %vm225_vm7, %v1728_v12 }
 0x14a   : >> { %1291 = vmatpush3.bf16.msra.mxu1 %v224_v26  ;;  %1292 = vmatprep.mubr.msk.bf16.mxu1 %vm1569_vm6, %v1568_v13 }
 0x14b   : >> { %1314 = vmatprep.subr.bf16.mxu1 %v1568_v13  ;;  %1297 = vmatpush3.bf16.msk.msra.mxu0 %vm1780_vm9, %v1570_v28 }
 0x14c   : >> { %1298 = vmatprep.mubr.msk.bf16.mxu0 %vm1569_vm6, %v1568_v13  ;;  %1302 = vmatprep.subr.bf16.mxu0 %v1568_v13 }
 0x151   : >> { %1293 = vmatmul.mubr.msk.bf16.vlgmr.msra.gmra.mrb[12].mxu1 %vm225_vm7, %v1728_v12 }
 0x152   : >> { %1315 = vmatpush3.bf16.msk.msra.mxu1 %vm1762_vm8, %v1570_v28  ;;  %1316 = vmatprep.mubr.msk.bf16.mxu1 %vm1569_vm6, %v1568_v13 }
 0x153   : >> { %1320 = vmatprep.subr.bf16.mxu1 %v1568_v13 }
 0x214   : >> { %v475_v45 = vpop.f32.mrb[4].mxu1  ;;  %v600_v46 = vpop.f32.mrb[8].mxu0 }
 0x215   : >> { %485 = vst.msk [vmem:[%s1847_s12] sm:$0xff] %vm484_vm10, %v475_v45  ;;  %1155 = vst.msk [vmem:[%s1847_s12 + $0x40] sm:$0xff] %vm484_vm10, %v600_v46  ;;  %v1258_v47 = vpop.f32.mrb[5].mxu1  ;;  %v1276_v48 = vpop.f32.mrb[9].mxu0 }
 0x216   : >> { %v478_v49 = vpop.f32.mrb[6].mxu1  ;;  %v603_v50 = vpop.f32.mrb[10].mxu0 }
 0x217   : >> { %v1259_v51 = vpop.f32.mrb[7].mxu1  ;;  %v1277_v52 = vpop.f32.mrb[11].mxu0 }
 0x21c   : >> { %v688_v53 = vpop.f32.mrb[12].mxu0  ;;  %v647_v54 = vpop.f32.mrb[8].mxu1 }
 0x21d   : >> { %v694_v55 = vpack.c.bf16 %v688_v53, %v688_v53  ;;  %v1288_v56 = vpop.f32.mrb[13].mxu0  ;;  %v1282_v57 = vpop.f32.mrb[9].mxu1  ;;  %v653_v2 = vpack.c.bf16 %v647_v54, %v647_v54 }
 0x21e   : >> { %v691_v58 = vpop.f32.mrb[14].mxu0  ;;  %v650_v59 = vpop.f32.mrb[10].mxu1 }
 0x21f   : >> { %v1289_v60 = vpop.f32.mrb[15].mxu0  ;;  %1299 = vmatmul.mubr.msk.bf16.vlgmr.msra.gmra.mrb[16].mxu0 %vm225_vm7, %v694_v55  ;;  %1317 = vmatmul.mubr.msk.bf16.vlgmr.msra.gmra.mrb[16].mxu1 %vm225_vm7, %v694_v55  ;;  %v1283_v61 = vpop.f32.mrb[11].mxu1 }
 0x220   : >> { %1303 = vmatpush3.bf16.msk.msra.mxu0 %vm1780_vm9, %v1570_v28  ;;  %1321 = vmatpush3.bf16.msk.msra.mxu1 %vm1762_vm8, %v1570_v28 }
 0x221   : >> { %1304 = vmatprep.mubr.msk.bf16.mxu0 %vm1569_vm6, %v1568_v13  ;;  %1308 = vmatprep.subr.bf16.mxu0 %v1568_v13 }
 0x222   : >> { %1322 = vmatprep.mubr.msk.bf16.mxu1 %vm1569_vm6, %v1568_v13  ;;  %1326 = vmatprep.subr.bf16.mxu1 %v1568_v13 }
 0x224   : >> { %v729_v62 = vpop.f32.mrb[12].mxu1 }
 0x225   : >> { %v1294_v63 = vpop.f32.mrb[13].mxu1  ;;  %v735_v6 = vpack.c.bf16 %v729_v62, %v729_v62 }
 0x226   : >> { %v732_v0 = vpop.f32.mrb[14].mxu1 }
 0x227   : >> { %v1295_v3 = vpop.f32.mrb[15].mxu1 }
 0x22b   : >> { %1305 = vmatmul.mubr.msk.bf16.vlgmr.msra.gmra.mrb[16].mxu0 %vm225_vm7, %v653_v2  ;;  %1323 = vmatmul.mubr.msk.bf16.vlgmr.msra.gmra.mrb[16].mxu1 %vm225_vm7, %v653_v2 }
 0x22c   : >> { %1309 = vmatpush3.bf16.msk.msra.mxu0 %vm1780_vm9, %v1570_v28  ;;  %1327 = vmatpush3.bf16.msk.msra.mxu1 %vm1762_vm8, %v1570_v28 }
 0x22d   : >> { %1310 = vmatprep.mubr.msk.bf16.mxu0 %vm1569_vm6, %v1568_v13  ;;  %1328 = vmatprep.mubr.msk.bf16.mxu1 %vm1569_vm6, %v1568_v13 }
 0x237   : >> { %1311 = vmatmul.mubr.msk.bf16.vlgmr.msra.gmra.mrb[16].mxu0 %vm225_vm7, %v735_v6  ;;  %1329 = vmatmul.mubr.msk.bf16.vlgmr.msra.gmra.mrb[16].mxu1 %vm225_vm7, %v735_v6 }
 0x307   : > { %200 = sbr.rel (!%p198_p8) target bundleno = 69 (0x45), region = 81 }
 0x30a   : >> { %v859_v7 = vpop.f32.mrb[16].mxu0  ;;  %v983_v8 = vpop.f32.mrb[16].mxu1 }
 0x30b   : >> { %1169 = vst.msk [vmem:[%s1847_s12 + $0x20] sm:$0xff] %vm484_vm10, %v859_v7  ;;  %1180 = vst.msk [vmem:[%s1847_s12 + $0x60] sm:$0xff] %vm484_vm10, %v983_v8  ;;  %v1312_v11 = vpop.f32.mrb[17].mxu0  ;;  %v1330_v14 = vpop.f32.mrb[17].mxu1 }
 0x30c   : >> { %v862_v15 = vpop.f32.mrb[18].mxu0  ;;  %v986_v16 = vpop.f32.mrb[18].mxu1 }
 0x30d   : >> { %v1313_v17 = vpop.f32.mrb[19].mxu0  ;;  %v1331_v18 = vpop.f32.mrb[19].mxu1 }
 0x30e   : > { %1485 = shalt.err (!%p1482_p4)
}
 0x30f   : > { %s1486_s3 = scalar_lea.hbm %s1892_s17, 2048  ;;  %s1490_s18 = scalar_lea.hbm %s1945_s1, 4096 }
 0x310   : > { %p1487_p7 = scmp.ne.s32.totalorder %s1892_s17, %s1486_s3  ;;  %p1491_p1 = scmp.lt.u32.totalorder %s1892_s17, %s1945_s1 }
 0x311   : > { %p1492_p3 = scmp.lt.u32.totalorder %s1490_s18, %s1486_s3  ;;  %p1494_p9 = scmp.lt.u32.totalorder %s1486_s3, %s1892_s17 }
 0x312   : > { %p1488_p10 = pnand %p1487_p7, %p1957_p11 }
 0x313   : > { %p1493_p8 = por %p1492_p3, %p1491_p1 }
 0x314   : > { %p1489_p12 = pneg %p1488_p10 }
 0x315   : > { %p1495_p0 = por %p1494_p9, %p1493_p8 }
 0x317   : > { %p1496_p6 = pnand %p1495_p0, %p1489_p12 }
 0x319   : > { %1499 = shalt.err (!%p1496_p6)
}
 0x31a   : > { %s1572_s2 = smov 128   ;;  %s1573_s5 = smov 8  }
 0x31b   : > { %1366 = dma.vmem_to_hbm [thread:$0]  (%p1957_p11), %s1895_s22, 2048, %s1892_s17, %s994_s23, %s1572_s2, %s1572_s2, %s1573_s5  }
 0x31c PF: > { %s1025_s12 = sand.u32 1, %s1538_s6   ;;  %p1958_p13 = scmp.ne.s32.totalorder %s1950_s21, 0 }
 0x31d   : > { %p1959_p2 = scmp.ge.s32.totalorder %s1558_s11, 2  ;;  %s1026_s13 = scalar_lea.sflag [#allocation4], %s1025_s12 }
 0x31f   : > { %p1373_p5 = pnand %p1959_p2, %p1958_p13 }
 0x321   : > { %1533 = dma.done.wait (!%p1373_p5), %s1026_s13, 2048  }
 0x322   : > { %1535 = vsyncadd (!%p1373_p5), %s1026_s13, 4294965248  ;;  %s17_s11 = sadd.s32 1, %s1558_s11   ;;  %s1960_s6 = smov %s1542_s7 }
 0x323   : > { %p14_p4 = scmp.ge.s32.totalorder %s17_s11, 4   ;;  %s1961_s7 = smov %s1546_s8 }
 0x324   : > { %s1962_s8 = smov %s1640_s20  ;;  %s1963_s9 = smov %s1554_s10 }
 0x325   : > { %s1964_s10 = smov %s1966_s14  ;;  %16 = sbr.rel (!%p14_p4) target bundleno = 6 (0x6), region = 92 }
 0x32c   :  { %1031 = vsyncpa [#allocation3], 1 }
 0x32d   :  { %1033 = vsyncpa [#allocation3 + $0x1], 1 }
 0x32e   :  { %1034 = vsyncpa [#allocation4], 1 }
 0x32f   :  { %1036 = vsyncpa [#allocation4 + $0x1], 1 }

</bundles_post_ra>
